<compile_context>
chip_gen: v5e
topology: v5e:2x2
jax: 0.10.0
libtpu: 0.0.40
codegen_flags: <defaults>
</compile_context>

<pallas_src>
import jax
import jax.numpy as jnp
import numpy as np
from jax.experimental import pallas as pl
from jax.experimental.pallas import tpu as pltpu

NUM_CLASSES = 8
IGNORE_INDEX = 255
UPPER_BOUND = 1.0
NORM = False      # module default

_CHUNK = 1024     # inner compute chunk (lanes); keeps per-chunk temporaries in vregs
_NSPLIT = 2       # pixel-half split (megacore work units when N is small)


def _ceil_to(x, m):
    return ((x + m - 1) // m) * m


def _class_stats_kernel(x_ref, t_ref, s_ref, n_ref):
    # x_ref: (1, C, tile)   f32 logits tile (classes = sublanes, pixels = lanes)
    # t_ref: (1, 1, tile)   int32 labels tile
    # s_ref: (1, 1, C, 1)   f32 per-(image, half) per-class sum of -log p_target
    # n_ref: (1, 1, C, 1)   f32 per-(image, half) per-class valid pixel count
    j = pl.program_id(2)

    @pl.when(j == 0)
    def _():
        s_ref[...] = jnp.zeros_like(s_ref)
        n_ref[...] = jnp.zeros_like(n_ref)

    C = x_ref.shape[1]
    tile = x_ref.shape[2]
    n_chunks = tile // _CHUNK

    # Hoisted: class-index iota is chunk-invariant (JAX does not CSE broadcasts).
    cls = jax.lax.broadcasted_iota(jnp.int32, (C, _CHUNK), 0)

    s_t = jnp.zeros((C, 1), jnp.float32)
    n_t = jnp.zeros((C, 1), jnp.float32)
    # Static inner loop over register-sized chunks: intermediates (exp, lse, mask)
    # live in vregs, so the only VMEM traffic is the input block itself.
    for k in range(n_chunks):
        lo = k * _CHUNK
        hi = lo + _CHUNK
        logits = x_ref[0, :, lo:hi]                         # (C, CHUNK) f32
        t = t_ref[0, :, lo:hi]                              # (1, CHUNK) int32

        # log-softmax denominator over the class (sublane) axis
        m = jnp.max(logits, axis=0, keepdims=True)          # (1, CHUNK)
        lse = jnp.log(jnp.sum(jnp.exp(logits - m), axis=0, keepdims=True)) + m

        # Targets are in [0, C), IGNORE_INDEX (255), or ignore-padding, so a single
        # range check excludes both ignore and padding.
        valid = (t >= 0) & (t < C)                          # (1, CHUNK)
        mask = (cls == t) & valid                           # (C, CHUNK)

        # -log p_target = lse - logits[target]; selects instead of onehot*mul.
        s_t = s_t + jnp.sum(jnp.where(mask, lse - logits, 0.0),
                            axis=1, keepdims=True)          # (C, 1)
        n_t = n_t + jnp.sum(jnp.where(mask, 1.0, 0.0),
                            axis=1, keepdims=True)          # (C, 1)

    # Output block stays VMEM-resident across the (arbitrary) pixel-tile axis, so
    # it doubles as the accumulator; HBM writeback happens once per (image, half).
    s_ref[...] = s_ref[...] + s_t.reshape(1, 1, C, 1)
    n_ref[...] = n_ref[...] + n_t.reshape(1, 1, C, 1)


def image_based_ce_loss(inputs, targets, task_weights, *, tile_pixels=32768):
    """inputs: [N, C, H, W] float; targets: [N, H, W] int; task_weights: [1] f32."""
    N, C, H, W = inputs.shape
    P = H * W

    # ---- tiling: NSPLIT pixel halves, each covered by J tiles of `tile` pixels ----
    half = -(-P // _NSPLIT)                                  # ceil(P / NSPLIT)
    half_c = _ceil_to(half, _CHUNK)
    max_tile = max(_CHUNK, (tile_pixels // _CHUNK) * _CHUNK)
    num_tiles = -(-half_c // max_tile)                       # J: grid steps per half
    tile = _ceil_to(-(-half_c // num_tiles), _CHUNK)         # chunk-aligned tile
    half_pad = num_tiles * tile
    P_pad = _NSPLIT * half_pad

    x = inputs.reshape(N, C, P).astype(jnp.float32)
    t = targets.reshape(N, 1, P).astype(jnp.int32)
    if P_pad != P:
        x = jnp.pad(x, ((0, 0), (0, 0), (0, P_pad - P)))
        t = jnp.pad(t, ((0, 0), (0, 0), (0, P_pad - P)),
                    constant_values=IGNORE_INDEX)

    per_sums, per_counts = pl.pallas_call(
        _class_stats_kernel,
        out_shape=(
            jax.ShapeDtypeStruct((N, _NSPLIT, C, 1), jnp.float32),
            jax.ShapeDtypeStruct((N, _NSPLIT, C, 1), jnp.float32),
        ),
        grid_spec=pltpu.PrefetchScalarGridSpec(
            num_scalar_prefetch=0,
            grid=(N, _NSPLIT, num_tiles),
            in_specs=[
                pl.BlockSpec((1, C, tile),
                             lambda n, s, j: (n, 0, s * num_tiles + j)),
                pl.BlockSpec((1, 1, tile),
                             lambda n, s, j: (n, 0, s * num_tiles + j)),
            ],
            out_specs=[
                pl.BlockSpec((1, 1, C, 1), lambda n, s, j: (n, s, 0, 0)),
                pl.BlockSpec((1, 1, C, 1), lambda n, s, j: (n, s, 0, 0)),
            ],
        ),
        # image axis and pixel-half axis are independent -> "parallel" (2x on v7x's
        # two TensorCores even for N==1; no-op on v5e/v6e). Pixel-tile axis carries
        # the resident output accumulator -> "arbitrary".
        compiler_params=pltpu.CompilerParams(
            dimension_semantics=("parallel", "parallel", "arbitrary")),
    )(x, t)

    # ---- tiny JAX epilogue: per-image histogram weighting + batch combine ----
    sums = jnp.sum(per_sums[:, :, :, 0], axis=1)             # (N, C)
    counts = jnp.sum(per_counts[:, :, :, 0], axis=1)         # (N, C)
    total = jnp.sum(counts, axis=1, keepdims=True)           # (N, 1)
    hist = counts / jnp.maximum(total, 1.0)                  # np.histogram(normed=True)
    if NORM:
        w = jnp.where(counts > 0.0,
                      UPPER_BOUND * (1.0 / jnp.maximum(hist, 1e-30)), 0.0) + 1.0
    else:
        w = jnp.where(counts > 0.0, UPPER_BOUND * (1.0 - hist), 0.0) + 1.0
    num = jnp.sum(w * sums, axis=1)                          # (N,)
    den = jnp.sum(w * counts, axis=1)                        # (N,)
    # NOTE: an all-ignored image gives den == 0 -> NaN, identical to PyTorch NLLLoss.
    losses = num / den
    return jnp.mean(losses) / jnp.exp(task_weights) + 0.5 * task_weights


def _reference(inputs, targets, task_weights):
    """Pure-JAX reference matching the PyTorch module (per-image weighting)."""
    N, C, H, W = inputs.shape
    logp = jax.nn.log_softmax(inputs.astype(jnp.float32), axis=1)
    losses = []
    for i in range(N):
        t = targets[i]
        valid = (t != IGNORE_INDEX) & (t >= 0) & (t < C)
        counts = jnp.stack(
            [jnp.sum(((t == c) & valid).astype(jnp.float32)) for c in range(C)])
        hist = counts / jnp.maximum(counts.sum(), 1.0)
        w = jnp.where(counts > 0, UPPER_BOUND * (1.0 - hist), 0.0) + 1.0
        tc = jnp.clip(t, 0, C - 1)
        lp_t = jnp.take_along_axis(logp[i], tc[None], axis=0)[0]
        wt = w[tc] * valid.astype(jnp.float32)
        losses.append(jnp.sum(wt * (-lp_t)) / jnp.sum(wt))
    return jnp.mean(jnp.stack(losses)) / jnp.exp(task_weights) + 0.5 * task_weights


if __name__ == "__main__":
    key = jax.random.PRNGKey(0)
    k1, k2, k3 = jax.random.split(key, 3)

    N, C, H, W = 2, NUM_CLASSES, 16, 16
    inputs = jax.random.normal(k1, (N, C, H, W), jnp.float32)
    targets = jax.random.randint(k2, (N, H, W), 0, C).astype(jnp.int32)
    # sprinkle some ignore_index pixels
    ignore_mask = jax.random.bernoulli(k3, 0.05, (N, H, W))
    targets = jnp.where(ignore_mask, IGNORE_INDEX, targets)

    # deterministic parameter init: nn.Parameter(torch.ones(1))
    task_weights = jnp.ones((1,), jnp.float32)

    out = jax.block_until_ready(image_based_ce_loss(inputs, targets, task_weights))
    ref = jax.block_until_ready(_reference(inputs, targets, task_weights))
    np.testing.assert_allclose(np.asarray(out), np.asarray(ref), rtol=1e-5, atol=1e-5)

    # Second shape: H*W not a multiple of 128 exercises the ignore-index padding path.
    k4, k5 = jax.random.split(k3)
    H2, W2 = 13, 11
    inputs2 = jax.random.normal(k4, (N, C, H2, W2), jnp.float32)
    targets2 = jax.random.randint(k5, (N, H2, W2), 0, C).astype(jnp.int32)
    out2 = jax.block_until_ready(image_based_ce_loss(inputs2, targets2, task_weights))
    ref2 = jax.block_until_ready(_reference(inputs2, targets2, task_weights))
    np.testing.assert_allclose(np.asarray(out2), np.asarray(ref2), rtol=1e-5, atol=1e-5)

    print("KERNEL_OK")
</pallas_src>

<mosaic_0001>
module attributes {stable_mosaic.version = 11 : i64} {
  func.func @_class_stats_kernel(%arg0: i32, %arg1: i32, %arg2: i32, %arg3: memref<1x8x1024xf32, #tpu.memory_space<vmem>>, %arg4: memref<1x1x1024xi32, #tpu.memory_space<vmem>>, %arg5: memref<1x1x8x1xf32, #tpu.memory_space<vmem>>, %arg6: memref<1x1x8x1xf32, #tpu.memory_space<vmem>>) attributes {dimension_semantics = [#tpu.dimension_semantics<parallel>, #tpu.dimension_semantics<parallel>, #tpu.dimension_semantics<arbitrary>], iteration_bounds = array<i64: 2, 2, 1>, scalar_prefetch = 0 : i64, scratch_operands = 0 : i64, tpu.core_type = #tpu.core_type<tc>, window_params = [{transform_indices = @transform_0, window_bounds = array<i64: 1, 8, 1024>}, {transform_indices = @transform_1, window_bounds = array<i64: 1, 1, 1024>}, {transform_indices = @transform_2, window_bounds = array<i64: 1, 1, 8, 1>}, {transform_indices = @transform_3, window_bounds = array<i64: 1, 1, 8, 1>}]} {
    %c0_i32 = arith.constant 0 : i32
    %0 = arith.cmpi eq, %arg2, %c0_i32 : i32
    %1 = arith.extui %0 : i1 to i32
    %c0_i32_0 = arith.constant 0 : i32
    %2 = arith.cmpi ne, %1, %c0_i32_0 : i32
    scf.if %2 {
      %cst_31 = arith.constant 0.000000e+00 : f32
      %49 = vector.broadcast %cst_31 : f32 to vector<1x1x8x1xf32>
      %c0_32 = arith.constant 0 : index
      %c0_33 = arith.constant 0 : index
      %c0_34 = arith.constant 0 : index
      %c0_35 = arith.constant 0 : index
      %50 = vector.load %arg5[%c0_32, %c0_33, %c0_34, %c0_35] : memref<1x1x8x1xf32, #tpu.memory_space<vmem>>, vector<1x1x8x1xf32>
      tpu.vector_store %arg5[%c0_32, %c0_33, %c0_34, %c0_35], %49 {strides = array<i32>} : memref<1x1x8x1xf32, #tpu.memory_space<vmem>>, vector<1x1x8x1xf32>,
      %cst_36 = arith.constant 0.000000e+00 : f32
      %51 = vector.broadcast %cst_36 : f32 to vector<1x1x8x1xf32>
      %c0_37 = arith.constant 0 : index
      %c0_38 = arith.constant 0 : index
      %c0_39 = arith.constant 0 : index
      %c0_40 = arith.constant 0 : index
      %52 = vector.load %arg6[%c0_37, %c0_38, %c0_39, %c0_40] : memref<1x1x8x1xf32, #tpu.memory_space<vmem>>, vector<1x1x8x1xf32>
      tpu.vector_store %arg6[%c0_37, %c0_38, %c0_39, %c0_40], %51 {strides = array<i32>} : memref<1x1x8x1xf32, #tpu.memory_space<vmem>>, vector<1x1x8x1xf32>,
    } else {
    }
    %3 = tpu.iota {dimensions = array<i32: 0>} : vector<8x1024xi32>
    %cst = arith.constant 0.000000e+00 : f32
    %4 = vector.broadcast %cst : f32 to vector<8x1xf32>
    %cst_1 = arith.constant 0.000000e+00 : f32
    %5 = vector.broadcast %cst_1 : f32 to vector<8x1xf32>
    %c0 = arith.constant 0 : index
    %c0_2 = arith.constant 0 : index
    %c0_3 = arith.constant 0 : index
    %6 = vector.load %arg3[%c0, %c0_2, %c0_3] : memref<1x8x1024xf32, #tpu.memory_space<vmem>>, vector<1x8x1024xf32>
    %7 = vector.shape_cast %6 : vector<1x8x1024xf32> to vector<8x1024xf32>
    %c0_4 = arith.constant 0 : index
    %c0_5 = arith.constant 0 : index
    %c0_6 = arith.constant 0 : index
    %8 = vector.load %arg4[%c0_4, %c0_5, %c0_6] : memref<1x1x1024xi32, #tpu.memory_space<vmem>>, vector<1x1x1024xi32>
    %9 = vector.shape_cast %8 : vector<1x1x1024xi32> to vector<1x1024xi32>
    %cst_7 = arith.constant dense<0xFF800000> : vector<1024xf32>
    %10 = vector.multi_reduction <maximumf>, %7, %cst_7 [0] : vector<8x1024xf32> to vector<1024xf32>
    %11 = vector.shape_cast %10 : vector<1024xf32> to vector<1x1024xf32>
    %12 = vector.broadcast %11 : vector<1x1024xf32> to vector<8x1024xf32>
    %13 = arith.subf %7, %12 : vector<8x1024xf32>
    %14 = math.exp %13 : vector<8x1024xf32>
    %cst_8 = arith.constant dense<0.000000e+00> : vector<1024xf32>
    %15 = vector.multi_reduction <add>, %14, %cst_8 [0] : vector<8x1024xf32> to vector<1024xf32>
    %16 = vector.shape_cast %15 : vector<1024xf32> to vector<1x1024xf32>
    %17 = math.log %16 : vector<1x1024xf32>
    %18 = arith.addf %17, %11 : vector<1x1024xf32>
    %c0_i32_9 = arith.constant 0 : i32
    %19 = vector.broadcast %c0_i32_9 : i32 to vector<1x1024xi32>
    %20 = arith.cmpi sge, %9, %19 : vector<1x1024xi32>
    %c8_i32 = arith.constant 8 : i32
    %21 = vector.broadcast %c8_i32 : i32 to vector<1x1024xi32>
    %22 = arith.cmpi slt, %9, %21 : vector<1x1024xi32>
    %23 = arith.andi %20, %22 : vector<1x1024xi1>
    %24 = vector.broadcast %9 : vector<1x1024xi32> to vector<8x1024xi32>
    %25 = arith.cmpi eq, %3, %24 : vector<8x1024xi32>
    %26 = vector.broadcast %23 : vector<1x1024xi1> to vector<8x1024xi1>
    %27 = arith.andi %25, %26 : vector<8x1024xi1>
    %28 = vector.broadcast %18 : vector<1x1024xf32> to vector<8x1024xf32>
    %29 = arith.subf %28, %7 : vector<8x1024xf32>
    %cst_10 = arith.constant 0.000000e+00 : f32
    %30 = vector.broadcast %cst_10 : f32 to vector<8x1024xf32>
    %31 = arith.select %27, %29, %30 : vector<8x1024xi1>, vector<8x1024xf32>
    %cst_11 = arith.constant dense<0.000000e+00> : vector<8xf32>
    %32 = vector.multi_reduction <add>, %31, %cst_11 [1] : vector<8x1024xf32> to vector<8xf32>
    %33 = vector.shape_cast %32 : vector<8xf32> to vector<8x1xf32>
    %34 = arith.addf %4, %33 : vector<8x1xf32>
    %cst_12 = arith.constant 1.000000e+00 : f32
    %cst_13 = arith.constant 0.000000e+00 : f32
    %35 = vector.broadcast %cst_12 : f32 to vector<8x1024xf32>
    %36 = vector.broadcast %cst_13 : f32 to vector<8x1024xf32>
    %37 = arith.select %27, %35, %36 : vector<8x1024xi1>, vector<8x1024xf32>
    %cst_14 = arith.constant dense<0.000000e+00> : vector<8xf32>
    %38 = vector.multi_reduction <add>, %37, %cst_14 [1] : vector<8x1024xf32> to vector<8xf32>
    %39 = vector.shape_cast %38 : vector<8xf32> to vector<8x1xf32>
    %40 = arith.addf %5, %39 : vector<8x1xf32>
    %c0_15 = arith.constant 0 : index
    %c0_16 = arith.constant 0 : index
    %c0_17 = arith.constant 0 : index
    %c0_18 = arith.constant 0 : index
    %41 = vector.load %arg5[%c0_15, %c0_16, %c0_17, %c0_18] : memref<1x1x8x1xf32, #tpu.memory_space<vmem>>, vector<1x1x8x1xf32>
    %42 = vector.shape_cast %34 : vector<8x1xf32> to vector<1x1x8x1xf32>
    %43 = arith.addf %41, %42 : vector<1x1x8x1xf32>
    %c0_19 = arith.constant 0 : index
    %c0_20 = arith.constant 0 : index
    %c0_21 = arith.constant 0 : index
    %c0_22 = arith.constant 0 : index
    %44 = vector.load %arg5[%c0_19, %c0_20, %c0_21, %c0_22] : memref<1x1x8x1xf32, #tpu.memory_space<vmem>>, vector<1x1x8x1xf32>
    tpu.vector_store %arg5[%c0_19, %c0_20, %c0_21, %c0_22], %43 {strides = array<i32>} : memref<1x1x8x1xf32, #tpu.memory_space<vmem>>, vector<1x1x8x1xf32>,
    %c0_23 = arith.constant 0 : index
    %c0_24 = arith.constant 0 : index
    %c0_25 = arith.constant 0 : index
    %c0_26 = arith.constant 0 : index
    %45 = vector.load %arg6[%c0_23, %c0_24, %c0_25, %c0_26] : memref<1x1x8x1xf32, #tpu.memory_space<vmem>>, vector<1x1x8x1xf32>
    %46 = vector.shape_cast %40 : vector<8x1xf32> to vector<1x1x8x1xf32>
    %47 = arith.addf %45, %46 : vector<1x1x8x1xf32>
    %c0_27 = arith.constant 0 : index
    %c0_28 = arith.constant 0 : index
    %c0_29 = arith.constant 0 : index
    %c0_30 = arith.constant 0 : index
    %48 = vector.load %arg6[%c0_27, %c0_28, %c0_29, %c0_30] : memref<1x1x8x1xf32, #tpu.memory_space<vmem>>, vector<1x1x8x1xf32>
    tpu.vector_store %arg6[%c0_27, %c0_28, %c0_29, %c0_30], %47 {strides = array<i32>} : memref<1x1x8x1xf32, #tpu.memory_space<vmem>>, vector<1x1x8x1xf32>,
    return
  }
  func.func @transform_0(%arg0: i32, %arg1: i32, %arg2: i32) -> (i32, i32, i32) {
    %c1_i32 = arith.constant 1 : i32
    %0 = arith.muli %arg1, %c1_i32 : i32
    %1 = arith.addi %0, %arg2 : i32
    %c0_i32 = arith.constant 0 : i32
    %c0_i32_0 = arith.constant 0 : i32
    return %arg0, %c0_i32, %1 : i32, i32, i32
  }
  func.func @transform_1(%arg0: i32, %arg1: i32, %arg2: i32) -> (i32, i32, i32) {
    %c1_i32 = arith.constant 1 : i32
    %0 = arith.muli %arg1, %c1_i32 : i32
    %1 = arith.addi %0, %arg2 : i32
    %c0_i32 = arith.constant 0 : i32
    %c0_i32_0 = arith.constant 0 : i32
    return %arg0, %c0_i32, %1 : i32, i32, i32
  }
  func.func @transform_2(%arg0: i32, %arg1: i32, %arg2: i32) -> (i32, i32, i32, i32) {
    %c0_i32 = arith.constant 0 : i32
    %c0_i32_0 = arith.constant 0 : i32
    %c0_i32_1 = arith.constant 0 : i32
    return %arg0, %arg1, %c0_i32, %c0_i32_0 : i32, i32, i32, i32
  }
  func.func @transform_3(%arg0: i32, %arg1: i32, %arg2: i32) -> (i32, i32, i32, i32) {
    %c0_i32 = arith.constant 0 : i32
    %c0_i32_0 = arith.constant 0 : i32
    %c0_i32_1 = arith.constant 0 : i32
    return %arg0, %arg1, %c0_i32, %c0_i32_0 : i32, i32, i32, i32
  }
}

</mosaic_0001>

<bundles_post_ra>
// kernel: tpu_custom_call.1
= control target key start
LH: loop header
LB: loop body
LE: loop exit
PB: predicated region body
PF: predicated region fallthrough
CT: control target
= control target key end

     0   :  { %9 = vsyncpa [#allocation3], 0  ;;  %s1467_s0 = inlined_call_operand.hbm [shape: f32[2,8,2048], index: 0, kind: input, shape index: {}]   ;;  %s1468_s1 = inlined_call_operand.hbm [shape: s32[2,1,2048], index: 1, kind: input, shape index: {}]   ;;  %s1469_s2 = inlined_call_operand.vmem [shape: f32[2,2,8,1], index: 2, kind: output, shape index: {0}]   ;;  %s1470_s3 = inlined_call_operand.vmem [shape: f32[2,2,8,1], index: 3, kind: output, shape index: {1}]  }
   0x1   :  { %11 = vsyncpa [#allocation3 + $0x1], 0 }
   0x2   :  { %12 = vsyncpa [#allocation5], 0 }
   0x3   :  { %14 = vsyncpa [#allocation5 + $0x1], 0  ;;  %s1009_s12 = smov 0   ;;  %s1011_s13 = smov 0  }
   0x4   :  { %s1013_s14 = smov 0   ;;  %s1015_s15 = smov 0  }
   0x5   :  { %s1017_s16 = smov 0   ;;  %s1019_s17 = smov 0  }
   0x6   :  { %s1021_s18 = smov 0   ;;  %s1023_s19 = smov 0  }
   0x7 LB: > { %s725_s20 = sadd.s32 4294967295, %s985_s19   ;;  %s35_s21 = sadd.s32 1, %s977_s17  ;;  %s985_s19 = sphi %s1023_s19, %s20_s19   ;;  %s981_s18 = sphi %s1021_s18, %s1522_s18   ;;  %s977_s17 = sphi %s1019_s17, %s1521_s17   ;;  %s973_s16 = sphi %s1017_s16, %s1520_s16   ;;  %s969_s15 = sphi %s1015_s15, %s1519_s15   ;;  %s965_s14 = sphi %s1013_s14, %s1518_s14   ;;  %s961_s13 = sphi %s1011_s13, %s1517_s13   ;;  %s957_s12 = sphi %s1009_s12, %s1516_s12  }
   0x8   : > { %p37_p0 = scmp.ge.s32.totalorder %s35_s21, 2  ;;  %s39_s22 = sadd.s32 1, %s981_s18 }
   0x9   : > { %s50_s23 = sadd.s32 1, %s965_s14  ;;  %p57_p1 = scmp.ne.s32.totalorder %s965_s14, %s961_s13 }
   0xa   : > { %s1524_s21 = smov (%p37_p0, %s35_s21), 0  ;;  %s1526_s22 = smov (!%p37_p0, %s39_s22), %s981_s18 }
   0xb   : > { %s46_s24 = ssub.s32 %s977_s17, %s1524_s21  ;;  %p58_p2 = scmp.eq.s32.totalorder %s985_s19, 0 }
   0xc   : > { %p41_p3 = scmp.ge.s32.totalorder %s1526_s22, 2  ;;  %p63_p4 = scmp.ne.s32.totalorder %s961_s13, %s957_s12 }
   0xd   : > { %p1060_p5 = por %p58_p2, %p57_p1  ;;  %p64_p6 = scmp.eq.s32.totalorder %s725_s20, 0 }
   0xe   : > { %s1528_s22 = smov (%p41_p3, %s1526_s22), 0  ;;  %p756_p8 = scmp.lt.s32.totalorder %s985_s19, 4 }
   0xf   : > { %p1066_p7 = por %p64_p6, %p63_p4  ;;  %s45_s27 = ssub.s32 %s981_s18, %s1528_s22 }
  0x10   : > { %s47_s28 = sor.u32 %s46_s24, %s45_s27  ;;  %s1074_s29 = sand.u32 1, %s965_s14  }
  0x11   : > { %p48_p9 = scmp.eq.s32.totalorder %s47_s28, 0  ;;  %s729_s30 = sshll.u32 %s1074_s29, 6 }
  0x12   : > { %s730_s4 = sshll.u32 %s977_s17, 3  ;;  %s731_s6 = sshll.u32 %s981_s18, 4 }
  0x13   : > { %s1079_s5 = scalar_select %p48_p9, %s965_s14, %s50_s23  }
  0x14   : > { %s183_s7 = sadd.s32 %s731_s6, %s730_s4  ;;  %s177_s8 = scalar_lea.vmem [#allocation2], %s729_s30 }
  0x15   : > { %s189_s9 = sshll.u32 %s177_s8, 4  ;;  %s732_s10 = sshll.u32 %s183_s7, 3  ;;  %s190_s9 = int_to_ptr.vmem [resolvable:$true] %s189_s9 }
  0x16   : > { %s185_s20 = scalar_lea.hbm %s1467_s0, %s732_s10  ;;  %p1089_p10 = pnand %p756_p8, %p1060_p5 }
  0x17   : > { %s187_s23 = sshll.u32 %s185_s20, 4  ;;  %p736_p11 = scmp.ge.s32.totalorder %s985_s19, 1  ;;  %s188_s23 = int_to_ptr.hbm [resolvable:$true] %s187_s23 }
  0x18   : > { %s174_s27 = scalar_lea.sflag [#allocation3], %s1074_s29  ;;  %p216_p12 = scmp.lt.s32.totalorder %s985_s19, 5 }
  0x19   : > { %752 = dma.hbm_to_vmem [thread:$0]  (!%p1089_p10), %s188_s23, 1024, %s190_s9, %s174_s27  }
  0x1a   : > { %s733_s28 = sshll.u32 %s1074_s29, 3  ;;  %s207_s25 = scalar_lea.hbm %s1468_s1, %s183_s7 }
  0x1b   : > { %p217_p13 = pnand %p736_p11, %p216_p12  ;;  %s209_s6 = sshll.u32 %s207_s25, 4  ;;  %s210_s6 = int_to_ptr.hbm [resolvable:$true] %s209_s6 }
  0x1c   : > { %s200_s8 = scalar_lea.vmem [#allocation4], %s733_s28  ;;  %s197_s11 = scalar_lea.sflag [#allocation5], %s1074_s29 }
  0x1d   : > { %s211_s10 = sshll.u32 %s200_s8, 4  ;;  %220 = sbr.rel (%p217_p13) target bundleno = 230 (0xe6), region = 28  ;;  %s212_s10 = int_to_ptr.vmem [resolvable:$true] %s211_s10 }
  0x1e   : > { %755 = dma.hbm_to_vmem [thread:$0]  (!%p1089_p10), %s210_s6, 128, %s212_s10, %s197_s11  }
  0x1f   : > { %s222_s12 = sand.u32 (!%p217_p13), 1, %s961_s13  }
  0x20   : > { %s737_s9 = sshll.u32 (!%p217_p13), %s222_s12, 6  ;;  %s223_s20 = scalar_lea.sflag (!%p217_p13), [#allocation3], %s222_s12 }
  0x21   : > { %s226_s23 = scalar_lea.vmem (!%p217_p13), [#allocation2], %s737_s9 }
  0x22   : > { %948 = dma.done.wait (%p1066_p7), %s223_s20, 1024  }
  0x23   : > { %950 = vsyncadd (%p1066_p7), %s223_s20, 4294966272  ;;  %s738_s7 = sshll.u32 %s222_s12, 3  ;;  %s233_s27 = scalar_lea.sflag [#allocation5], %s222_s12 }
  0x24   : > { %s1110_s28 = scalar_lea.vmem [#allocation4], %s738_s7 }
  0x25   : > { %952 = dma.done.wait (%p1066_p7), %s233_s27, 128  }
  0x26   : > { %954 = vsyncadd (%p1066_p7), %s233_s27, 4294967168  ;;  %v1116_v0 = vld [vmem:[%s226_s23] sm:$0xff]  ;;  %v1118_v1 = vld [vmem:[%s226_s23 + $0x8] sm:$0xff]  ;;  %p280_p0 = scmp.lt.s32.totalorder %s973_s16, 1  ;;  %p282_p1 = scmp.lt.s32.totalorder %s969_s15, 1  ;;  %vm1471_vm15 = vcmask 7168  }
  0x27   : > { %v1120_v2 = vld [vmem:[%s226_s23 + $0x10] sm:$0xff]  ;;  %v1122_v3 = vld [vmem:[%s226_s23 + $0x18] sm:$0xff]  ;;  %v1124_v4 = vld [vmem:[%s226_s23 + $0x20] sm:$0xff]  ;;  %v314_v6 = vrot.slane %v1116_v0, 4  ;;  %v320_v7 = vrot.slane %v1118_v1, 4 }
  0x28   : > { %v1126_v5 = vld [vmem:[%s226_s23 + $0x28] sm:$0xff]  ;;  %v326_v8 = vrot.slane %v1120_v2, 4  ;;  %v1131_v9 = vld [vmem:[%s226_s23 + $0x30] sm:$0xff]  ;;  %v1133_v10 = vld [vmem:[%s226_s23 + $0x38] sm:$0xff]  ;;  %v332_v11 = vrot.slane %v1122_v3, 4  ;;  %v338_v12 = vrot.slane %v1124_v4, 4 }
  0x29   : > { %v344_v13 = vrot.slane %v1126_v5, 4  ;;  %v315_v14 = vmax.f32 %v1116_v0, %v314_v6  ;;  %v321_v15 = vmax.f32 %v1118_v1, %v320_v7  ;;  %v350_v17 = vrot.slane %v1131_v9, 4  ;;  %v1169_v58 = vld [vmem:[%s1110_s28] sm:$0xff]  ;;  %s1530_s16 = smov (!%p280_p0, %s973_s16), 1  ;;  %s1532_s15 = smov (!%p282_p1, %s969_s15), 1 }
  0x2a   : > { %v327_v16 = vmax.f32 %v1120_v2, %v326_v8  ;;  %v333_v18 = vmax.f32 %v1122_v3, %v332_v11  ;;  %v339_v19 = vmax.f32 %v1124_v4, %v338_v12  ;;  %v356_v21 = vrot.slane %v1133_v10, 4  ;;  %s739_s26 = sshll.u32 %s1530_s16, 1 }
  0x2b   : > { %v345_v20 = vmax.f32 %v1126_v5, %v344_v13  ;;  %v316_v22 = vrot.slane %v315_v14, 2  ;;  %v322_v23 = vrot.slane %v321_v15, 2  ;;  %v351_v25 = vmax.f32 %v1131_v9, %v350_v17  ;;  %s1227_s29 = sadd.s32 %s739_s26, %s1532_s15 }
  0x2c   : > { %v328_v24 = vrot.slane %v327_v16, 2  ;;  %v334_v26 = vrot.slane %v333_v18, 2  ;;  %v340_v27 = vrot.slane %v339_v19, 2  ;;  %v357_v29 = vmax.f32 %v1133_v10, %v356_v21  ;;  %s740_s15 = sshll.u32 %s1227_s29, 3 }
  0x2d   : > { %v346_v28 = vrot.slane %v345_v20, 2  ;;  %v317_v30 = vmax.f32 %v315_v14, %v316_v22  ;;  %v323_v31 = vmax.f32 %v321_v15, %v322_v23  ;;  %v352_v33 = vrot.slane %v351_v25, 2  ;;  %s1256_s30 = scalar_lea.vmem %s1469_s2, %s740_s15  ;;  %s1383_s6 = scalar_lea.vmem %s1470_s3, %s740_s15 }
  0x2e   : > { %v329_v32 = vmax.f32 %v327_v16, %v328_v24  ;;  %v335_v34 = vmax.f32 %v333_v18, %v334_v26  ;;  %v341_v35 = vmax.f32 %v339_v19, %v340_v27  ;;  %v358_v37 = vrot.slane %v357_v29, 2 }
  0x2f   : > { %v347_v36 = vmax.f32 %v345_v20, %v346_v28  ;;  %v318_v38 = vrot.slane %v317_v30, 1  ;;  %v324_v39 = vrot.slane %v323_v31, 1  ;;  %v353_v41 = vmax.f32 %v351_v25, %v352_v33 }
  0x30   : > { %v330_v40 = vrot.slane %v329_v32, 1  ;;  %v336_v42 = vrot.slane %v335_v34, 1  ;;  %v342_v43 = vrot.slane %v341_v35, 1  ;;  %v359_v45 = vmax.f32 %v357_v29, %v358_v37 }
  0x31   : > { %v348_v44 = vrot.slane %v347_v36, 1  ;;  %v1148_v46 = vmax.f32 %v317_v30, %v318_v38  ;;  %v1150_v47 = vmax.f32 %v323_v31, %v324_v39  ;;  %v354_v49 = vrot.slane %v353_v41, 1 }
  0x32   : > { %v1152_v48 = vmax.f32 %v329_v32, %v330_v40  ;;  %v1154_v50 = vmax.f32 %v335_v34, %v336_v42  ;;  %v1156_v51 = vmax.f32 %v341_v35, %v342_v43  ;;  %v360_v53 = vrot.slane %v359_v45, 1 }
  0x33   : > { %v1158_v52 = vmax.f32 %v347_v36, %v348_v44  ;;  %v1160_v54 = vmax.f32 %v353_v41, %v354_v49  ;;  %v362_v55 = vsub.f32 %v1116_v0, %v1148_v46  ;;  %v363_v56 = vsub.f32 %v1118_v1, %v1150_v47 }
  0x34   : > { %v364_v57 = vsub.f32 %v1120_v2, %v1152_v48  ;;  %v1171_v59 = vmax.f32 %v359_v45, %v360_v53  ;;  %v365_v60 = vsub.f32 %v1122_v3, %v1154_v50  ;;  %v366_v61 = vsub.f32 %v1124_v4, %v1156_v51 }
  0x35   : > { %v367_v62 = vsub.f32 %v1126_v5, %v1158_v52  ;;  %v368_v63 = vsub.f32 %v1131_v9, %v1160_v54  ;;  %v370_v6 = vmul.f32 1.442695, %v362_v55  ;;  %v372_v7 = vmul.f32 1.442695, %v363_v56 }
  0x36   : > { %v374_v8 = vmul.f32 1.442695, %v364_v57  ;;  %v369_v11 = vsub.f32 %v1133_v10, %v1171_v59  ;;  %v376_v12 = vmul.f32 1.442695, %v365_v60  ;;  %v378_v13 = vmul.f32 1.442695, %v366_v61 }
  0x37   : > { %823 = vpow2.f32 %v370_v6  ;;  %v380_v14 = vmul.f32 1.442695, %v367_v62  ;;  %vm458_vm0 = vcmp.ge.s32.totalorder %v1169_v58, 0  ;;  %vm459_vm1 = vcmp.lt.s32.totalorder %v1169_v58, 8 }
  0x38   : > { %825 = vpow2.f32 %v372_v7  ;;  %v303_v15 = vlaneseq  ;;  %v382_v16 = vmul.f32 1.442695, %v368_v63  ;;  %v384_v17 = vmul.f32 1.442695, %v369_v11  ;;  %vm460_vm2 = vmand %vm458_vm0, %vm459_vm1 }
  0x39   : > { %827 = vpow2.f32 %v374_v8  ;;  %v461_v20 = vperm.slane %v1169_v58, 0  ;;  %v462_v21 = vperm.slane %v1169_v58, 1  ;;  %v463_v24 = vperm.slane %v1169_v58, 2 }
  0x3a   : > { %829 = vpow2.f32 %v376_v12  ;;  %v1185_v19 = vshrl.u32 %v303_v15, 7  ;;  %v987_v25 = vmov 0   ;;  %v464_v29 = vperm.slane %v1169_v58, 3 }
  0x3b   : > { %831 = vpow2.f32 %v378_v13  ;;  %v1191_v26 = vsel %vm460_vm2, 1, %v987_v25  ;;  %v465_v30 = vperm.slane %v1169_v58, 4  ;;  %v466_v31 = vperm.slane %v1169_v58, 5 }
  0x3c   : > { %833 = vpow2.f32 %v380_v14  ;;  %v467_v35 = vperm.slane %v1169_v58, 6  ;;  %v468_v36 = vperm.slane %v1169_v58, 7  ;;  %v478_v40 = vperm.slane %v1191_v26, 0 }
  0x3d   : > { %v824_v18 = vpop.eup %823  ;;  %835 = vpow2.f32 %v382_v16  ;;  %v479_v41 = vperm.slane %v1191_v26, 1  ;;  %v480_v49 = vperm.slane %v1191_v26, 2  ;;  %v481_v60 = vperm.slane %v1191_v26, 3 }
  0x3e   : > { %v826_v22 = vpop.eup %825  ;;  %837 = vpow2.f32 %v384_v17  ;;  %v386_v23 = vrot.slane %v824_v18, 4  ;;  %vm1209_vm3 = vcmp.eq.s32.totalorder %v1185_v19, %v461_v20  ;;  %vm1217_vm4 = vcmp.eq.s32.totalorder %v1185_v19, %v462_v21 }
  0x3f   : > { %v828_v27 = vpop.eup %827  ;;  %v392_v28 = vrot.slane %v826_v22, 4  ;;  %vm1223_vm5 = vcmp.eq.s32.totalorder %v1185_v19, %v463_v24  ;;  %vm1230_vm6 = vcmp.eq.s32.totalorder %v1185_v19, %v464_v29  ;;  %vm1235_vm7 = vcmp.eq.s32.totalorder %v478_v40, 1 }
  0x40   : > { %v830_v32 = vpop.eup %829  ;;  %v387_v33 = vadd.f32 %v824_v18, %v386_v23  ;;  %v398_v34 = vrot.slane %v828_v27, 4  ;;  %vm1239_vm8 = vcmp.eq.s32.totalorder %v479_v41, 1  ;;  %vm1246_vm9 = vcmp.eq.s32.totalorder %v1185_v19, %v465_v30  ;;  %vm494_vm11 = vmand %vm1209_vm3, %vm1235_vm7 }
  0x41   : > { %v832_v37 = vpop.eup %831  ;;  %v393_v38 = vadd.f32 %v826_v22, %v392_v28  ;;  %v404_v39 = vrot.slane %v830_v32, 4  ;;  %v482_v40 = vperm.slane %v1191_v26, 4  ;;  %vm1259_vm10 = vcmp.eq.s32.totalorder %v480_v49, 1  ;;  %vm1472_vm14 = vmand %vm1217_vm4, %vm1239_vm8 }
  0x42   : > { %v834_v42 = vpop.eup %833  ;;  %v388_v43 = vrot.slane %v387_v33, 2  ;;  %v399_v44 = vadd.f32 %v828_v27, %v398_v34  ;;  %v410_v45 = vrot.slane %v832_v37, 4  ;;  %vm1270_vm12 = vcmp.eq.s32.totalorder %v1185_v19, %v466_v31  ;;  %vm1474_vm1 = vmand %vm1223_vm5, %vm1259_vm10 }
  0x43   : > { %v836_v53 = vpop.eup %835  ;;  %v394_v55 = vrot.slane %v393_v38, 2  ;;  %v405_v56 = vadd.f32 %v830_v32, %v404_v39  ;;  %v416_v57 = vrot.slane %v834_v42, 4  ;;  %vm1276_vm13 = vcmp.eq.s32.totalorder %v481_v60, 1  ;;  %vm1505_vm3 = vmand %vm1223_vm5, %vm1259_vm10 }
  0x44   : > { %v838_v61 = vpop.eup %837  ;;  %v389_v62 = vadd.f32 %v388_v43, %v387_v33  ;;  %v400_v63 = vrot.slane %v399_v44, 2  ;;  %v411_v6 = vadd.f32 %v832_v37, %v410_v45  ;;  %v422_v7 = vrot.slane %v836_v53, 4  ;;  %vm1508_vm7 = vmand %vm1230_vm6, %vm1276_vm13 }
  0x45   : > { %v395_v11 = vadd.f32 %v394_v55, %v393_v38  ;;  %v406_v12 = vrot.slane %v405_v56, 2  ;;  %v417_v13 = vadd.f32 %v834_v42, %v416_v57  ;;  %v428_v14 = vrot.slane %v838_v61, 4 }
  0x46   : > { %v390_v16 = vrot.slane %v389_v62, 1  ;;  %v401_v17 = vadd.f32 %v400_v63, %v399_v44  ;;  %v412_v18 = vrot.slane %v411_v6, 2  ;;  %v423_v22 = vadd.f32 %v836_v53, %v422_v7 }
  0x47   : > { %v396_v20 = vrot.slane %v395_v11, 1  ;;  %v407_v23 = vadd.f32 %v406_v12, %v405_v56  ;;  %v418_v25 = vrot.slane %v417_v13, 2  ;;  %v429_v27 = vadd.f32 %v838_v61, %v428_v14 }
  0x48   : > { %v391_v32 = vadd.f32 %v390_v16, %v389_v62  ;;  %v402_v33 = vrot.slane %v401_v17, 1  ;;  %v413_v21 = vadd.f32 %v412_v18, %v411_v6  ;;  %v424_v34 = vrot.slane %v423_v22, 2 }
  0x49   : > { %v397_v37 = vadd.f32 %v396_v20, %v395_v11  ;;  %v408_v38 = vrot.slane %v407_v23, 1  ;;  %v419_v39 = vadd.f32 %v418_v25, %v417_v13  ;;  %v430_v42 = vrot.slane %v429_v27, 2 }
  0x4a   : > { %v403_v24 = vadd.f32 %v402_v33, %v401_v17  ;;  %v414_v44 = vrot.slane %v413_v21, 1  ;;  %v425_v45 = vadd.f32 %v424_v34, %v423_v22  ;;  %839 = vlog2.f32 %v391_v32 }
  0x4b   : > { %v409_v53 = vadd.f32 %v408_v38, %v407_v23  ;;  %v420_v55 = vrot.slane %v419_v39, 1  ;;  %v431_v56 = vadd.f32 %v430_v42, %v429_v27  ;;  %841 = vlog2.f32 %v397_v37 }
  0x4c   : > { %v415_v57 = vadd.f32 %v414_v44, %v413_v21  ;;  %v426_v61 = vrot.slane %v425_v45, 1  ;;  %843 = vlog2.f32 %v403_v24  ;;  %v483_v12 = vperm.slane %v1191_v26, 5 }
  0x4d   : > { %v421_v29 = vadd.f32 %v420_v55, %v419_v39  ;;  %v432_v63 = vrot.slane %v431_v56, 1  ;;  %845 = vlog2.f32 %v409_v53  ;;  %v988_v18 = vmov 0.0  }
  0x4e   : > { %v427_v7 = vadd.f32 %v426_v61, %v425_v45  ;;  %847 = vlog2.f32 %v415_v57  ;;  %v528_v31 = vsel %vm494_vm11, 1.0, %v988_v18  ;;  %v529_v60 = vsel %vm1472_vm14, 1.0, %v988_v18  ;;  %301 = vst.msk [vmem:[%s1256_s30] sm:$0xff] %vm1471_vm15, %v988_v18  ;;  %vm1473_vm14 = vmand %vm1230_vm6, %vm1276_vm13 }
  0x4f   : > { %v433_v41 = vadd.f32 %v432_v63, %v431_v56  ;;  %849 = vlog2.f32 %v421_v29  ;;  %vm1302_vm0 = vcmp.eq.s32.totalorder %v1185_v19, %v467_v35  ;;  %v484_v25 = vperm.slane %v1191_v26, 6 }
  0x50   : > { %v840_v30 = vpop.eup %839  ;;  %851 = vlog2.f32 %v427_v7  ;;  %v485_v27 = vperm.slane %v1191_v26, 7  ;;  %vm1313_vm2 = vcmp.eq.s32.totalorder %v482_v40, 1  ;;  %v530_v26 = vsel %vm1474_vm1, 1.0, %v988_v18 }
  0x51   : > { %v842_v16 = vpop.eup %841  ;;  %v435_v17 = vmul.f32 0.6931472, %v840_v30  ;;  %853 = vlog2.f32 %v433_v41  ;;  %vm1324_vm15 = vcmp.eq.s32.totalorder %v483_v12, 1  ;;  %vm498_vm1 = vmand %vm1246_vm9, %vm1313_vm2  ;;  %vm1388_vm5 = vcmp.eq.s32.totalorder %v1185_v19, %v468_v36 }
  0x52   : > { %v844_v22 = vpop.eup %843  ;;  %v437_v20 = vmul.f32 0.6931472, %v842_v16  ;;  %vm499_vm6 = vmand %vm1270_vm12, %vm1324_vm15  ;;  %vm1399_vm10 = vcmp.eq.s32.totalorder %v485_v27, 1  ;;  %v532_v36 = vsel %vm498_vm1, 1.0, %v988_v18 }
  0x53   : > { %v846_v32 = vpop.eup %845  ;;  %v439_v33 = vmul.f32 0.6931472, %v844_v22  ;;  %v450_v21 = vadd.f32 %v435_v17, %v1148_v46  ;;  %v536_v46 = vadd.f32 %v529_v60, %v528_v31  ;;  %vm501_vm9 = vmand %vm1388_vm5, %vm1399_vm10 }
  0x54   : > { %v848_v35 = vpop.eup %847  ;;  %v441_v37 = vmul.f32 0.6931472, %v846_v32  ;;  %v451_v38 = vadd.f32 %v437_v20, %v1150_v47  ;;  %v531_v47 = vsel %vm1473_vm14, 1.0, %v988_v18  ;;  %vm1504_vm14 = vmand %vm1217_vm4, %vm1239_vm8  ;;  %vm1368_vm4 = vcmp.eq.s32.totalorder %v484_v25, 1 }
  0x55   : > { %v850_v42 = vpop.eup %849  ;;  %v443_v24 = vmul.f32 0.6931472, %v848_v35  ;;  %v452_v44 = vadd.f32 %v439_v33, %v1152_v48  ;;  %v502_v45 = vsub.f32 %v450_v21, %v1116_v0  ;;  %v537_v61 = vadd.f32 %v536_v46, %v530_v26  ;;  %v546_v14 = vld [vmem:[%s1256_s30] sm:$0xff] }
  0x56   : > { %v852_v53 = vpop.eup %851  ;;  %v445_v55 = vmul.f32 0.6931472, %v850_v42  ;;  %v453_v56 = vadd.f32 %v441_v37, %v1154_v50  ;;  %v503_v57 = vsub.f32 %v451_v38, %v1118_v1  ;;  %vm1511_vm8 = vcmask 7168  }
  0x57   : > { %v854_v29 = vpop.eup %853  ;;  %v447_v63 = vmul.f32 0.6931472, %v852_v53  ;;  %v454_v48 = vadd.f32 %v443_v24, %v1156_v51  ;;  %v504_v0 = vsub.f32 %v452_v44, %v1120_v2  ;;  %v510_v7 = vsel %vm494_vm11, %v502_v45, 0.0  ;;  %302 = vst.msk [vmem:[%s1383_s6] sm:$0xff] %vm1511_vm8, %v988_v18  ;;  %vm500_vm11 = vmand %vm1302_vm0, %vm1368_vm4 }
  0x58   : > { %v449_v40 = vmul.f32 0.6931472, %v854_v29  ;;  %v455_v41 = vadd.f32 %v445_v55, %v1158_v52  ;;  %v505_v50 = vsub.f32 %v453_v56, %v1122_v3  ;;  %v511_v1 = vsel %vm1504_vm14, %v503_v57, 0.0  ;;  %vm1514_vm12 = vmmov %vm1511_vm8 }
  0x59   : > { %v456_v51 = vadd.f32 %v447_v63, %v1160_v54  ;;  %v506_v2 = vsub.f32 %v454_v48, %v1124_v4  ;;  %v512_v3 = vsel %vm1505_vm3, %v504_v0, 0.0  ;;  %v518_v52 = vadd.f32 %v511_v1, %v510_v7  ;;  %vm1515_vm13 = vmmov %vm1511_vm8 }
  0x5a   : > { %v457_v8 = vadd.f32 %v449_v40, %v1171_v59  ;;  %v507_v54 = vsub.f32 %v455_v41, %v1126_v5  ;;  %v513_v4 = vsel %vm1508_vm7, %v505_v50, 0.0  ;;  %v538_v28 = vadd.f32 %v537_v61, %v531_v47 }
  0x5b   : > { %v519_v5 = vadd.f32 %v518_v52, %v512_v3  ;;  %v508_v58 = vsub.f32 %v456_v51, %v1131_v9  ;;  %v514_v19 = vsel %vm498_vm1, %v506_v2, 0.0  ;;  %v534_v31 = vsel %vm500_vm11, 1.0, %v988_v18 }
  0x5c   : > { %v509_v9 = vsub.f32 %v457_v8, %v1133_v10  ;;  %v515_v6 = vsel %vm499_vm6, %v507_v54, 0.0  ;;  %v539_v12 = vadd.f32 %v538_v28, %v532_v36  ;;  %v533_v10 = vsel %vm499_vm6, 1.0, %v988_v18 }
  0x5d   : > { %v520_v62 = vadd.f32 %v519_v5, %v513_v4  ;;  %v516_v13 = vsel %vm500_vm11, %v508_v58, 0.0  ;;  %v535_v20 = vsel %vm501_vm9, 1.0, %v988_v18 }
  0x5e   : > { %v517_v49 = vsel %vm501_vm9, %v509_v9, 0.0  ;;  %v540_v17 = vadd.f32 %v539_v12, %v533_v10  ;;  %v550_v32 = vld [vmem:[%s1383_s6] sm:$0xff] }
  0x5f   : > { %v521_v11 = vadd.f32 %v520_v62, %v514_v19 }
  0x60   : > { %v541_v22 = vadd.f32 %v540_v17, %v534_v31 }
  0x61   : > { %v522_v30 = vadd.f32 %v521_v11, %v515_v6 }
  0x62   : > { %v542_v23 = vadd.f32 %v541_v22, %v535_v20 }
  0x63   : > { %v523_v16 = vadd.f32 %v522_v30, %v516_v13 }
  0x65   : > { %v524_v60 = vadd.f32 %v523_v16, %v517_v49 }
  0x67   : > { %525 = vadd.xlane.f32.xlu0 %v524_v60 }
  0x6f   : > { %543 = vadd.xlane.f32.xlu0 %v542_v23 }
  0xda   : > { %v526_v25 = vpop.xlane.xlu0 %525 }
  0xdb   : > { %v547_v27 = vadd.f32 %v546_v14, %v526_v25 }
  0xdd   : > { %549 = vst.msk [vmem:[%s1256_s30] sm:$0xff] %vm1514_vm12, %v547_v27 }
  0xe2   : > { %v544_v33 = vpop.xlane.xlu0 %543 }
  0xe3   : > { %v551_v21 = vadd.f32 %v550_v32, %v544_v33 }
  0xe5   : > { %552 = vst.msk [vmem:[%s1383_s6] sm:$0xff] %vm1515_vm13, %v551_v21 }
  0xe6 PF: > { %s20_s19 = sadd.s32 1, %s985_s19   ;;  %s1516_s12 = smov %s961_s13 }
  0xe7   : > { %p17_p2 = scmp.ge.s32.totalorder %s20_s19, 6   ;;  %s1517_s13 = smov %s965_s14 }
  0xe8   : > { %s1518_s14 = smov %s1079_s5  ;;  %s1519_s15 = smov %s977_s17 }
  0xe9   : > { %s1520_s16 = smov %s981_s18  ;;  %s1521_s17 = smov %s1524_s21 }
  0xea   : > { %s1522_s18 = smov %s1528_s22  ;;  %19 = sbr.rel (!%p17_p2) target bundleno = 7 (0x7), region = 97 }
  0xef   :  { %602 = vsyncpa [#allocation3], 1 }
  0xf0   :  { %604 = vsyncpa [#allocation3 + $0x1], 1 }
  0xf1   :  { %605 = vsyncpa [#allocation5], 1 }
  0xf2   :  { %607 = vsyncpa [#allocation5 + $0x1], 1 }

</bundles_post_ra>
